<compile_context>
chip_gen: v7x
topology: tpu7x:2x2x1
jax: 0.10.0
libtpu: 0.0.40
codegen_flags: <defaults>
</compile_context>

<pallas_src>
import functools

import jax
import jax.numpy as jnp
from jax.experimental import pallas as pl
from jax.experimental.pallas import tpu as pltpu


def _round_up(x: int, m: int) -> int:
    return ((x + m - 1) // m) * m


# Conservative per-TensorCore budget for weights kept resident in VMEM
# (v7x has 64 MiB / TC; leave room for I/O tiles + activation temporaries).
_RESIDENT_BUDGET_BYTES = 36 << 20


def _choose_tm(n: int, max_dp: int) -> int:
    """Row-tile: multiple of 16 (bf16 sublane packing), bounded pad waste,
    capped by the widest padded feature dim, split when the grid would be 1."""
    cap = 512
    if max_dp >= 4096:
        cap = 128
    elif max_dp >= 2048:
        cap = 256
    n16 = _round_up(max(n, 1), 16)
    if n16 <= cap:
        tm = n16
    else:
        tm = 16
        for cand in (cap, 256, 128, 64, 32, 16):
            if cand > cap:
                continue
            waste = _round_up(n, cand) - n
            if waste <= max(n // 8, 16):
                tm = cand
                break
    # v7x has 2 TensorCores: a grid of 1 leaves one idle, so split the tile.
    if _round_up(n, tm) // tm == 1 and tm >= 32 and tm % 32 == 0:
        tm //= 2
    return tm


# --------------------------------------------------------------------------
# Fused path: whole MLP in one pallas_call, weights resident in VMEM.
# --------------------------------------------------------------------------

def _fused_mlp_kernel(*refs, num_layers: int, has_bias: bool, relu: bool):
    """refs = (x, w0[, b0], w1[, b1], ..., out).

    x:   (TM, D0p)        bf16 padded activations for this row tile
    wi:  (Din_p, Dout_p)  bf16 padded, pre-transposed weights (resident in VMEM)
    bi:  (1, Dout_p)      f32 padded bias row (resident in VMEM)
    out: (TM, DLp)        f32
    """
    x_ref = refs[0]
    o_ref = refs[-1]

    h = x_ref[...]                       # bf16
    idx = 1
    for layer in range(num_layers):
        w = refs[idx][...]               # bf16
        idx += 1
        acc = jnp.dot(h.astype(jnp.bfloat16), w,
                      preferred_element_type=jnp.float32)
        if has_bias:
            acc = acc + refs[idx][...]   # f32 bias row, broadcasts over rows
            idx += 1
        if relu and layer < num_layers - 1:
            acc = jnp.maximum(acc, 0.0)
        h = acc                          # f32; recast to bf16 at next dot
    o_ref[...] = h.astype(o_ref.dtype)


def _fused_mlp_forward(x, weights_pad, biases_pad, *, relu: bool, out_dim: int):
    n, d_in = x.shape
    num_layers = len(weights_pad)
    has_bias = biases_pad is not None

    d0_p = weights_pad[0].shape[0]
    d_last_p = weights_pad[-1].shape[1]
    max_dp = max(max(w.shape) for w in weights_pad)

    tm = _choose_tm(n, max_dp)
    n_pad = _round_up(n, tm)

    # Lane-dense bf16 input slab; zero padding never leaks into the real outputs
    # (padded weight rows/cols are zero, padded batch rows are sliced off).
    x_p = jnp.zeros((n_pad, d0_p), jnp.bfloat16).at[:n, :d_in].set(
        x.astype(jnp.bfloat16))

    kernel_args = [x_p]
    in_specs = [pl.BlockSpec((tm, d0_p), lambda i: (i, 0))]
    resident_bytes = 0
    for li in range(num_layers):
        w = weights_pad[li]
        kernel_args.append(w)
        # Whole array in VMEM, copied once, single-buffered (no pipelining).
        in_specs.append(pl.BlockSpec(memory_space=pltpu.MemorySpace.VMEM))
        resident_bytes += w.size * w.dtype.itemsize
        if has_bias:
            b = biases_pad[li]
            kernel_args.append(b)
            in_specs.append(pl.BlockSpec(memory_space=pltpu.MemorySpace.VMEM))
            resident_bytes += b.size * b.dtype.itemsize

    out_specs = pl.BlockSpec((tm, d_last_p), lambda i: (i, 0))
    out_shape = jax.ShapeDtypeStruct((n_pad, d_last_p), jnp.float32)

    # Explicit VMEM budget: resident params + double-buffered x/out tiles +
    # f32 activation temporaries, with headroom; capped at 64 MiB (v7x-safe).
    io_bytes = 2 * tm * d0_p * 2 + 2 * tm * d_last_p * 4
    act_bytes = 2 * tm * max_dp * 4
    vmem_limit = int((resident_bytes + io_bytes + act_bytes) * 1.25) + (4 << 20)
    vmem_limit = max(32 << 20, min(vmem_limit, 64 << 20))

    flops = 0
    bytes_accessed = x_p.size * 2 + n_pad * d_last_p * 4 + resident_bytes
    for w in weights_pad:
        din_p, dout_p = w.shape
        flops += 2 * n_pad * din_p * dout_p
    cost = pl.CostEstimate(flops=flops, transcendentals=0,
                           bytes_accessed=bytes_accessed)

    kernel = functools.partial(_fused_mlp_kernel, num_layers=num_layers,
                               has_bias=has_bias, relu=relu)

    out_p = pl.pallas_call(
        kernel,
        out_shape=out_shape,
        grid=(n_pad // tm,),
        in_specs=in_specs,
        out_specs=out_specs,
        compiler_params=pltpu.CompilerParams(
            dimension_semantics=("parallel",),
            vmem_limit_bytes=vmem_limit,
        ),
        cost_estimate=cost,
    )(*kernel_args)

    return out_p[:n, :out_dim]


# --------------------------------------------------------------------------
# Fallback path: per-layer tiled (M, N, K) matmul when weights are too large
# to keep all layers resident in VMEM simultaneously.
# --------------------------------------------------------------------------

def _linear_kernel(x_ref, w_ref, b_ref, o_ref, acc_ref, *, relu: bool):
    @pl.when(pl.program_id(2) == 0)
    def _():
        acc_ref[...] = jnp.zeros_like(acc_ref)

    acc_ref[...] += jnp.dot(x_ref[...], w_ref[...],
                            preferred_element_type=jnp.float32)

    @pl.when(pl.program_id(2) == pl.num_programs(2) - 1)
    def _():
        r = acc_ref[...] + b_ref[...]
        if relu:
            r = jnp.maximum(r, 0.0)
        o_ref[...] = r.astype(o_ref.dtype)


def _pick_tile(dim: int, cap: int) -> int:
    for t in (cap, 256, 128):
        if t <= cap and dim % t == 0:
            return t
    return 128  # padded dims are always multiples of 128


def _tiled_linear(x_p, w_p, b_p, *, relu: bool, out_dtype, tm: int):
    n_pad, d_in_p = x_p.shape
    _, d_out_p = w_p.shape
    tk = _pick_tile(d_in_p, 512)
    tn = _pick_tile(d_out_p, 512)
    grid = (n_pad // tm, d_out_p // tn, d_in_p // tk)
    return pl.pallas_call(
        functools.partial(_linear_kernel, relu=relu),
        out_shape=jax.ShapeDtypeStruct((n_pad, d_out_p), out_dtype),
        grid=grid,
        in_specs=[pl.BlockSpec((tm, tk), lambda i, j, k: (i, k)),
                  pl.BlockSpec((tk, tn), lambda i, j, k: (k, j)),
                  pl.BlockSpec((1, tn), lambda i, j, k: (0, j))],
        out_specs=pl.BlockSpec((tm, tn), lambda i, j, k: (i, j)),
        scratch_shapes=[pltpu.VMEM((tm, tn), jnp.float32)],
        compiler_params=pltpu.CompilerParams(
            dimension_semantics=("parallel", "parallel", "arbitrary"),
            vmem_limit_bytes=64 << 20,
        ),
    )(x_p, w_p, b_p)


def _layered_mlp_forward(x, weights_pad, biases_pad, *, relu: bool, out_dim: int):
    n, d_in = x.shape
    num_layers = len(weights_pad)
    d0_p = weights_pad[0].shape[0]

    tm = min(_choose_tm(n, 2048), 256)
    n_pad = _round_up(n, tm)

    h = jnp.zeros((n_pad, d0_p), jnp.bfloat16).at[:n, :d_in].set(
        x.astype(jnp.bfloat16))
    for li in range(num_layers):
        w = weights_pad[li]
        d_out_p = w.shape[1]
        if biases_pad is not None:
            b = biases_pad[li]
        else:
            b = jnp.zeros((1, d_out_p), jnp.float32)
        last = li == num_layers - 1
        out_dtype = jnp.float32 if last else jnp.bfloat16
        h = _tiled_linear(h, w, b, relu=(relu and not last),
                          out_dtype=out_dtype, tm=tm)
    return h[:n, :out_dim]


# --------------------------------------------------------------------------
# Model wrapper
# --------------------------------------------------------------------------

class PallasMLP:
    """Mirrors Model(input_dim, output_dim, hidden_dim, num_layers, C)."""

    def __init__(self, input_dim, output_dim, hidden_dim, num_layers,
                 relu=True, no_bias=False, key=None, force_layered=False):
        self.relu = relu
        self.no_bias = no_bias
        self.num_layers = num_layers
        self.output_dim = output_dim

        if num_layers == 1:
            dims = [(input_dim, output_dim)]
        else:
            dims = [(input_dim, hidden_dim)]
            dims += [(hidden_dim, hidden_dim)] * (num_layers - 2)
            dims += [(hidden_dim, output_dim)]

        key = jax.random.PRNGKey(42) if key is None else key

        # Unpadded f32 params (kept for the pure-JAX reference).
        self.weights_t = []   # (in, out) == W.T
        self.biases = []
        # Lane-dense padded params fed to the kernels (weights bf16, biases f32).
        weights_pad = []
        biases_pad = []

        for (d_in, d_out) in dims:
            key, wk = jax.random.split(key)
            # Deterministic init matching reset_params(): W ~ N(0, 1e-4), b = 0.
            w = jax.random.normal(wk, (d_out, d_in), dtype=jnp.float32) * 1e-4
            w_t = jnp.transpose(w)                       # (in, out)
            self.weights_t.append(w_t)
            b = None if no_bias else jnp.zeros((d_out,), dtype=jnp.float32)
            self.biases.append(b)

            d_in_p = max(128, _round_up(d_in, 128))
            d_out_p = max(128, _round_up(d_out, 128))
            w_p = (jnp.zeros((d_in_p, d_out_p), jnp.float32)
                   .at[:d_in, :d_out].set(w_t)).astype(jnp.bfloat16)
            weights_pad.append(w_p)
            if not no_bias:
                b_p = jnp.zeros((1, d_out_p), jnp.float32).at[0, :d_out].set(b)
                biases_pad.append(b_p)

        self.weights_pad = tuple(weights_pad)
        self.biases_pad = None if no_bias else tuple(biases_pad)

        # Residency guard: fused single-call path only if all padded bf16
        # weights (+ biases) fit the per-TensorCore VMEM budget.
        resident_bytes = sum(w.size * w.dtype.itemsize for w in self.weights_pad)
        if self.biases_pad is not None:
            resident_bytes += sum(b.size * b.dtype.itemsize for b in self.biases_pad)
        use_fused = (resident_bytes <= _RESIDENT_BUDGET_BYTES) and not force_layered
        fwd = _fused_mlp_forward if use_fused else _layered_mlp_forward

        self._jit_fwd = jax.jit(
            functools.partial(fwd, relu=self.relu, out_dim=self.output_dim))

    def __call__(self, x):
        """x: (n, input_dim) -> (n, output_dim), float32."""
        if x.shape[0] == 0:
            return jnp.zeros((0, self.output_dim), jnp.float32)
        return self._jit_fwd(x, self.weights_pad, self.biases_pad)


def _reference_forward(model: PallasMLP, x):
    """Pure-JAX reference mimicking the kernel precision (bf16 MXU, f32 acc)."""
    n_layers = len(model.weights_t)
    h = x
    for i, (w_t, b) in enumerate(zip(model.weights_t, model.biases)):
        h = jnp.dot(h.astype(jnp.bfloat16), w_t.astype(jnp.bfloat16),
                    preferred_element_type=jnp.float32)
        if b is not None:
            h = h + b
        if model.relu and i < n_layers - 1:
            h = jnp.maximum(h, 0.0)
    return h


if __name__ == "__main__":
    # Small shapes consistent with forward(X): X is (n, input_dim).
    n, input_dim, hidden_dim, output_dim, num_layers = 8, 16, 32, 8, 3

    key = jax.random.PRNGKey(0)
    kx, kp = jax.random.split(key)
    x = jax.random.normal(kx, (n, input_dim), dtype=jnp.float32)

    def check(out, ref):
        ref = jnp.asarray(ref)
        tol = 1e-2 * float(jnp.max(jnp.abs(ref))) + 1e-12
        assert out.shape == ref.shape
        assert bool(jnp.allclose(out, ref, atol=tol, rtol=1e-2))

    # 1) Fused resident-weights path (bias + ReLU).
    model = PallasMLP(input_dim, output_dim, hidden_dim, num_layers,
                      relu=True, no_bias=False, key=kp)
    out = jax.block_until_ready(model(x))
    assert out.shape == (n, output_dim)
    check(out, _reference_forward(model, x))

    # 2) Single-layer / no-bias config.
    model2 = PallasMLP(input_dim, output_dim, hidden_dim, 1,
                       relu=True, no_bias=True, key=kp)
    out2 = jax.block_until_ready(model2(x))
    check(out2, _reference_forward(model2, x))

    # 3) Tiled per-layer fallback path (same semantics, forced for coverage).
    model3 = PallasMLP(input_dim, output_dim, hidden_dim, num_layers,
                       relu=True, no_bias=False, key=kp, force_layered=True)
    out3 = jax.block_until_ready(model3(x))
    check(out3, _reference_forward(model3, x))

    print("KERNEL_OK")
</pallas_src>

<mosaic_0001>
module attributes {stable_mosaic.version = 11 : i64} {
  func.func @_fused_mlp_kernel(%arg0: i32, %arg1: memref<16x128xbf16, #tpu.memory_space<vmem>>, %arg2: memref<128x128xbf16, #tpu.memory_space<vmem>>, %arg3: memref<1x128xf32, #tpu.memory_space<vmem>>, %arg4: memref<128x128xbf16, #tpu.memory_space<vmem>>, %arg5: memref<1x128xf32, #tpu.memory_space<vmem>>, %arg6: memref<128x128xbf16, #tpu.memory_space<vmem>>, %arg7: memref<1x128xf32, #tpu.memory_space<vmem>>, %arg8: memref<16x128xf32, #tpu.memory_space<vmem>>) attributes {dimension_semantics = [#tpu.dimension_semantics<parallel>], iteration_bounds = array<i64: 1>, scalar_prefetch = 0 : i64, scratch_operands = 0 : i64, tpu.core_type = #tpu.core_type<tc>, window_params = [{transform_indices = @transform_0, window_bounds = array<i64: 16, 128>}, {pipeline_mode = #tpu.pipeline_mode<synchronous>, transform_indices = @transform_1, window_bounds = array<i64: 128, 128>}, {pipeline_mode = #tpu.pipeline_mode<synchronous>, transform_indices = @transform_2, window_bounds = array<i64: 1, 128>}, {pipeline_mode = #tpu.pipeline_mode<synchronous>, transform_indices = @transform_3, window_bounds = array<i64: 128, 128>}, {pipeline_mode = #tpu.pipeline_mode<synchronous>, transform_indices = @transform_4, window_bounds = array<i64: 1, 128>}, {pipeline_mode = #tpu.pipeline_mode<synchronous>, transform_indices = @transform_5, window_bounds = array<i64: 128, 128>}, {pipeline_mode = #tpu.pipeline_mode<synchronous>, transform_indices = @transform_6, window_bounds = array<i64: 1, 128>}, {transform_indices = @transform_7, window_bounds = array<i64: 16, 128>}]} {
    %c0 = arith.constant 0 : index
    %c0_0 = arith.constant 0 : index
    %0 = vector.load %arg1[%c0, %c0_0] : memref<16x128xbf16, #tpu.memory_space<vmem>>, vector<16x128xbf16>
    %c0_1 = arith.constant 0 : index
    %c0_2 = arith.constant 0 : index
    %1 = vector.load %arg2[%c0_1, %c0_2] : memref<128x128xbf16, #tpu.memory_space<vmem>>, vector<128x128xbf16>
    %cst = arith.constant dense<0.000000e+00> : vector<16x128xf32>
    %2 = tpu.matmul %0, %1, %cst {dimension_numbers = #tpu.dot_dimension_numbers<[1], [0], [0], [1], [0, 0, 1, 1], [], []>} : vector<16x128xbf16>, vector<128x128xbf16>, vector<16x128xf32> -> vector<16x128xf32>
    %c0_3 = arith.constant 0 : index
    %c0_4 = arith.constant 0 : index
    %3 = vector.load %arg3[%c0_3, %c0_4] : memref<1x128xf32, #tpu.memory_space<vmem>>, vector<1x128xf32>
    %4 = vector.broadcast %3 : vector<1x128xf32> to vector<16x128xf32>
    %5 = arith.addf %2, %4 : vector<16x128xf32>
    %cst_5 = arith.constant 0.000000e+00 : f32
    %6 = vector.broadcast %cst_5 : f32 to vector<16x128xf32>
    %7 = arith.maximumf %5, %6 : vector<16x128xf32>
    %c0_6 = arith.constant 0 : index
    %c0_7 = arith.constant 0 : index
    %8 = vector.load %arg4[%c0_6, %c0_7] : memref<128x128xbf16, #tpu.memory_space<vmem>>, vector<128x128xbf16>
    %9 = arith.truncf %7 : vector<16x128xf32> to vector<16x128xbf16>
    %cst_8 = arith.constant dense<0.000000e+00> : vector<16x128xf32>
    %10 = tpu.matmul %9, %8, %cst_8 {dimension_numbers = #tpu.dot_dimension_numbers<[1], [0], [0], [1], [0, 0, 1, 1], [], []>} : vector<16x128xbf16>, vector<128x128xbf16>, vector<16x128xf32> -> vector<16x128xf32>
    %c0_9 = arith.constant 0 : index
    %c0_10 = arith.constant 0 : index
    %11 = vector.load %arg5[%c0_9, %c0_10] : memref<1x128xf32, #tpu.memory_space<vmem>>, vector<1x128xf32>
    %12 = vector.broadcast %11 : vector<1x128xf32> to vector<16x128xf32>
    %13 = arith.addf %10, %12 : vector<16x128xf32>
    %cst_11 = arith.constant 0.000000e+00 : f32
    %14 = vector.broadcast %cst_11 : f32 to vector<16x128xf32>
    %15 = arith.maximumf %13, %14 : vector<16x128xf32>
    %c0_12 = arith.constant 0 : index
    %c0_13 = arith.constant 0 : index
    %16 = vector.load %arg6[%c0_12, %c0_13] : memref<128x128xbf16, #tpu.memory_space<vmem>>, vector<128x128xbf16>
    %17 = arith.truncf %15 : vector<16x128xf32> to vector<16x128xbf16>
    %cst_14 = arith.constant dense<0.000000e+00> : vector<16x128xf32>
    %18 = tpu.matmul %17, %16, %cst_14 {dimension_numbers = #tpu.dot_dimension_numbers<[1], [0], [0], [1], [0, 0, 1, 1], [], []>} : vector<16x128xbf16>, vector<128x128xbf16>, vector<16x128xf32> -> vector<16x128xf32>
    %c0_15 = arith.constant 0 : index
    %c0_16 = arith.constant 0 : index
    %19 = vector.load %arg7[%c0_15, %c0_16] : memref<1x128xf32, #tpu.memory_space<vmem>>, vector<1x128xf32>
    %20 = vector.broadcast %19 : vector<1x128xf32> to vector<16x128xf32>
    %21 = arith.addf %18, %20 : vector<16x128xf32>
    %c0_17 = arith.constant 0 : index
    %c0_18 = arith.constant 0 : index
    %22 = vector.load %arg8[%c0_17, %c0_18] : memref<16x128xf32, #tpu.memory_space<vmem>>, vector<16x128xf32>
    tpu.vector_store %arg8[%c0_17, %c0_18], %21 {strides = array<i32>} : memref<16x128xf32, #tpu.memory_space<vmem>>, vector<16x128xf32>,
    return
  }
  func.func @transform_0(%arg0: i32) -> (i32, i32) {
    %c0_i32 = arith.constant 0 : i32
    %c0_i32_0 = arith.constant 0 : i32
    return %arg0, %c0_i32 : i32, i32
  }
  func.func @transform_1(%arg0: i32) -> (i32, i32) {
    %c0_i32 = arith.constant 0 : i32
    %c0_i32_0 = arith.constant 0 : i32
    %c0_i32_1 = arith.constant 0 : i32
    return %c0_i32, %c0_i32_0 : i32, i32
  }
  func.func @transform_2(%arg0: i32) -> (i32, i32) {
    %c0_i32 = arith.constant 0 : i32
    %c0_i32_0 = arith.constant 0 : i32
    %c0_i32_1 = arith.constant 0 : i32
    return %c0_i32, %c0_i32_0 : i32, i32
  }
  func.func @transform_3(%arg0: i32) -> (i32, i32) {
    %c0_i32 = arith.constant 0 : i32
    %c0_i32_0 = arith.constant 0 : i32
    %c0_i32_1 = arith.constant 0 : i32
    return %c0_i32, %c0_i32_0 : i32, i32
  }
  func.func @transform_4(%arg0: i32) -> (i32, i32) {
    %c0_i32 = arith.constant 0 : i32
    %c0_i32_0 = arith.constant 0 : i32
    %c0_i32_1 = arith.constant 0 : i32
    return %c0_i32, %c0_i32_0 : i32, i32
  }
  func.func @transform_5(%arg0: i32) -> (i32, i32) {
    %c0_i32 = arith.constant 0 : i32
    %c0_i32_0 = arith.constant 0 : i32
    %c0_i32_1 = arith.constant 0 : i32
    return %c0_i32, %c0_i32_0 : i32, i32
  }
  func.func @transform_6(%arg0: i32) -> (i32, i32) {
    %c0_i32 = arith.constant 0 : i32
    %c0_i32_0 = arith.constant 0 : i32
    %c0_i32_1 = arith.constant 0 : i32
    return %c0_i32, %c0_i32_0 : i32, i32
  }
  func.func @transform_7(%arg0: i32) -> (i32, i32) {
    %c0_i32 = arith.constant 0 : i32
    %c0_i32_0 = arith.constant 0 : i32
    return %arg0, %c0_i32 : i32, i32
  }
}

</mosaic_0001>

<bundles_post_ra>
// kernel: _fused_mlp_forward.1
= control target key start
LH: loop header
LB: loop body
LE: loop exit
PB: predicated region body
PF: predicated region fallthrough
CT: control target
= control target key end

     0   :  { %12 = vsyncpa [#allocation3], 0  ;;  %s790_s0 = inlined_call_operand.vmem [shape: bf16[16,128], index: 0, kind: input, shape index: {}]   ;;  %s791_s1 = inlined_call_operand.hbm [shape: bf16[128,128], index: 1, kind: input, shape index: {}]   ;;  %s792_s2 = inlined_call_operand.vmem [shape: f32[1,128], index: 2, kind: input, shape index: {}]   ;;  %s793_s3 = inlined_call_operand.hbm [shape: bf16[128,128], index: 3, kind: input, shape index: {}]   ;;  %s794_s4 = inlined_call_operand.vmem [shape: f32[1,128], index: 4, kind: input, shape index: {}]   ;;  %s795_s5 = inlined_call_operand.hbm [shape: bf16[128,128], index: 5, kind: input, shape index: {}]   ;;  %s796_s6 = inlined_call_operand.vmem [shape: f32[1,128], index: 6, kind: input, shape index: {}]   ;;  %s797_s7 = inlined_call_operand.vmem [shape: f32[16,128], index: 7, kind: output, shape index: {}]  }
   0x1   :  { %13 = vsyncpa [#allocation5], 0  ;;  %s643_s24 = smov [#allocation4]   ;;  %s644_s26 = smov [#allocation2]  }
   0x2   :  { %s35_s25 = sshll.u32 %s643_s24, 4  ;;  %s21_s27 = sshll.u32 %s644_s26, 4  ;;  %s36_s25 = int_to_ptr.vmem [resolvable:$true] %s35_s25  ;;  %s690_s27 = int_to_ptr.vmem [resolvable:$true] %s21_s27 }
   0x3   :  { %s573_s30 = scalar_lea.hbm %s793_s3, 1024 }
   0x4   :  { %p574_p0 = scmp.ne.s32.totalorder %s793_s3, %s573_s30  ;;  %p577_p1 = scmp.lt.u32.totalorder %s573_s30, %s793_s3 }
   0x6   :  { %p579_p2 = pnand %p577_p1, %p574_p0 }
   0x8   :  { %582 = shalt.err (!%p579_p2)
}
   0x9   :  { %s583_s12 = scalar_lea.vmem %s36_s25, 1024  ;;  %p588_p4 = scmp.lt.s32.totalorder %s36_s25, %s36_s25 }
   0xa   :  { %p584_p3 = scmp.ne.s32.totalorder %s36_s25, %s583_s12  ;;  %p589_p5 = scmp.lt.s32.totalorder %s583_s12, %s583_s12 }
   0xc   :  { %p590_p6 = por %p589_p5, %p588_p4 }
   0xe   :  { %p591_p7 = pnand %p590_p6, %p584_p3 }
  0x10   :  { %594 = shalt.err (!%p591_p7)
}
  0x11   :  { %s645_s13 = smov 64   ;;  %s646_s14 = smov 4  }
  0x12   :  { %41 = dma.hbm_to_vmem [thread:$0]  %s793_s3, 1024, %s36_s25, [#allocation5], %s645_s13, %s645_s13, %s646_s14  }
  0x13   :  { %s595_s19 = scalar_lea.hbm %s791_s1, 1024 }
  0x14   :  { %p596_p8 = scmp.ne.s32.totalorder %s791_s1, %s595_s19  ;;  %p599_p9 = scmp.lt.u32.totalorder %s595_s19, %s791_s1 }
  0x16   :  { %p601_p10 = pnand %p599_p9, %p596_p8 }
  0x18   :  { %604 = shalt.err (!%p601_p10)
}
  0x19   :  { %s605_s24 = scalar_lea.vmem %s690_s27, 1024  ;;  %p610_p12 = scmp.lt.s32.totalorder %s690_s27, %s690_s27 }
  0x1a   :  { %p606_p11 = scmp.ne.s32.totalorder %s690_s27, %s605_s24  ;;  %p611_p13 = scmp.lt.s32.totalorder %s605_s24, %s605_s24 }
  0x1c   :  { %p612_p0 = por %p611_p13, %p610_p12 }
  0x1e   :  { %p613_p1 = pnand %p612_p0, %p606_p11 }
  0x20   :  { %616 = shalt.err (!%p613_p1)
}
  0x21   :  { %27 = dma.hbm_to_vmem [thread:$0]  %s791_s1, 1024, %s690_s27, [#allocation3], %s645_s13, %s645_s13, %s646_s14  }
  0x22   :  { %s647_s26 = smov [#allocation6]   ;;  %s617_s8 = scalar_lea.hbm %s795_s5, 1024 }
  0x23   :  { %s49_s28 = sshll.u32 %s647_s26, 4  ;;  %p618_p2 = scmp.ne.s32.totalorder %s795_s5, %s617_s8  ;;  %s50_s28 = int_to_ptr.vmem [resolvable:$true] %s49_s28 }
  0x24   :  { %p621_p3 = scmp.lt.u32.totalorder %s617_s8, %s795_s5 }
  0x26   :  { %p623_p4 = pnand %p621_p3, %p618_p2 }
  0x28   :  { %626 = shalt.err (!%p623_p4)
}
  0x29   :  { %s627_s15 = scalar_lea.vmem %s50_s28, 1024  ;;  %p632_p6 = scmp.lt.s32.totalorder %s50_s28, %s50_s28 }
  0x2a   :  { %p628_p5 = scmp.ne.s32.totalorder %s50_s28, %s627_s15  ;;  %p633_p7 = scmp.lt.s32.totalorder %s627_s15, %s627_s15 }
  0x2c   :  { %p634_p8 = por %p633_p7, %p632_p6 }
  0x2e   :  { %p635_p9 = pnand %p634_p8, %p628_p5 }
  0x30   :  { %638 = shalt.err (!%p635_p9)
}
  0x31   :  { %55 = dma.hbm_to_vmem [thread:$0]  %s795_s5, 1024, %s50_s28, [#allocation5], %s645_s13, %s645_s13, %s646_s14  }
  0x32   :  { %639 = dma.done.wait [#allocation3], 1024  }
  0x33   :  { %640 = vsyncadd [#allocation3], 4294966272 }
  0x34   :  { %641 = dma.done.wait [#allocation5], 2048  }
  0x35   :  { %642 = vsyncadd [#allocation5], 4294965248  ;;  %v648_v0 = vmov 0.0   ;;  %vm649_vm0 = vmmov 0   ;;  %v548_v1 = vld [vmem:[#allocation2] sm:$0xff]   ;;  %v549_v2 = vld [vmem:[#allocation2 + $0x8] sm:$0xff]  }
  0x36   :  { %481 = vmatprep.subr.bf16.mxu0 %v648_v0  ;;  %497 = vmatprep.mubr.msk.bf16.mxu0 %vm649_vm0, %v648_v0  ;;  %v550_v3 = vld [vmem:[#allocation2 + $0x10] sm:$0xff]   ;;  %v557_v4 = vld [vmem:[#allocation4] sm:$0xff]   ;;  %v551_v5 = vld [vmem:[#allocation2 + $0x18] sm:$0xff]  }
  0x37   :  { %501 = vmatprep.subr.bf16.mxu1 %v648_v0  ;;  %517 = vmatprep.mubr.msk.bf16.mxu1 %vm649_vm0, %v648_v0  ;;  %v558_v6 = vld [vmem:[#allocation4 + $0x8] sm:$0xff]   ;;  %v552_v7 = vld [vmem:[#allocation2 + $0x20] sm:$0xff]   ;;  %v559_v8 = vld [vmem:[#allocation4 + $0x10] sm:$0xff]  }
  0x38   :  { %482 = vmatpush3.bf16.msra.mxu0 %v548_v1  ;;  %502 = vmatpush3.bf16.msra.mxu1 %v557_v4  ;;  %v553_v9 = vld [vmem:[#allocation2 + $0x28] sm:$0xff]   ;;  %v560_v10 = vld [vmem:[#allocation4 + $0x18] sm:$0xff]   ;;  %v554_v11 = vld [vmem:[#allocation2 + $0x30] sm:$0xff]  }
  0x39   :  { %483 = vmatprep.subr.bf16.mxu0 %v648_v0  ;;  %503 = vmatprep.subr.bf16.mxu1 %v648_v0  ;;  %v561_v12 = vld [vmem:[#allocation4 + $0x20] sm:$0xff]   ;;  %v555_v13 = vld [vmem:[#allocation2 + $0x38] sm:$0xff]   ;;  %v562_v14 = vld [vmem:[#allocation4 + $0x28] sm:$0xff]  }
  0x3a   :  { %v556_v15 = vld [vmem:[%s790_s0] sm:$0xff]   ;;  %v563_v16 = vld [vmem:[#allocation4 + $0x30] sm:$0xff]   ;;  %v564_v17 = vld [vmem:[#allocation4 + $0x38] sm:$0xff]  }
  0x3b   :  { %v565_v18 = vld [vmem:[#allocation6] sm:$0xff]   ;;  %v566_v19 = vld [vmem:[#allocation6 + $0x8] sm:$0xff]   ;;  %v567_v20 = vld [vmem:[#allocation6 + $0x10] sm:$0xff]  }
  0x3c   :  { %484 = vmatpush3.bf16.msra.mxu0 %v549_v2  ;;  %504 = vmatpush3.bf16.msra.mxu1 %v558_v6  ;;  %v568_v21 = vld [vmem:[#allocation6 + $0x18] sm:$0xff]   ;;  %v569_v22 = vld [vmem:[#allocation6 + $0x20] sm:$0xff]   ;;  %v570_v23 = vld [vmem:[#allocation6 + $0x28] sm:$0xff]  }
  0x3d   :  { %485 = vmatprep.subr.bf16.mxu0 %v648_v0  ;;  %505 = vmatprep.subr.bf16.mxu1 %v648_v0  ;;  %v426_v24 = vld [vmem:[%s792_s2] ss:$0 sm:$0xff]  ;;  %v571_v34 = vld [vmem:[#allocation6 + $0x30] sm:$0xff]   ;;  %v572_v35 = vld [vmem:[#allocation6 + $0x38] sm:$0xff]  }
  0x3e   :  { %v436_v36 = vld [vmem:[%s794_s4] ss:$0 sm:$0xff] }
  0x3f   :  { %v445_v46 = vld [vmem:[%s796_s6] ss:$0 sm:$0xff] }
  0x40   :  { %486 = vmatpush3.bf16.msra.mxu0 %v550_v3  ;;  %506 = vmatpush3.bf16.msra.mxu1 %v559_v8 }
  0x41   :  { %487 = vmatprep.subr.bf16.mxu0 %v648_v0  ;;  %507 = vmatprep.subr.bf16.mxu1 %v648_v0 }
  0x44   :  { %488 = vmatpush3.bf16.msra.mxu0 %v551_v5  ;;  %508 = vmatpush3.bf16.msra.mxu1 %v560_v10 }
  0x45   :  { %489 = vmatprep.subr.bf16.mxu0 %v648_v0  ;;  %509 = vmatprep.subr.bf16.mxu1 %v648_v0 }
  0x48   :  { %490 = vmatpush3.bf16.msra.mxu0 %v552_v7  ;;  %510 = vmatpush3.bf16.msra.mxu1 %v561_v12 }
  0x49   :  { %491 = vmatprep.subr.bf16.mxu0 %v648_v0  ;;  %511 = vmatprep.subr.bf16.mxu1 %v648_v0 }
  0x4c   :  { %492 = vmatpush3.bf16.msra.mxu0 %v553_v9  ;;  %512 = vmatpush3.bf16.msra.mxu1 %v562_v14 }
  0x4d   :  { %493 = vmatprep.subr.bf16.mxu0 %v648_v0  ;;  %513 = vmatprep.subr.bf16.mxu1 %v648_v0 }
  0x50   :  { %494 = vmatpush3.bf16.msra.mxu0 %v554_v11  ;;  %514 = vmatpush3.bf16.msra.mxu1 %v563_v16 }
  0x51   :  { %495 = vmatprep.subr.bf16.mxu0 %v648_v0  ;;  %515 = vmatprep.subr.bf16.mxu1 %v648_v0 }
  0x54   :  { %496 = vmatpush3.bf16.msra.mxu0 %v555_v13  ;;  %516 = vmatpush3.bf16.msra.mxu1 %v564_v17 }
  0x55   :  { %521 = vmatprep.subr.bf16.mxu0 %v648_v0 }
  0x57   :  { %498 = vmatmul.mubr.bf16.vlgmr.msra.gmra.mrb[0].mxu0 %v556_v15 }
  0x58   :  { %537 = vmatprep.mubr.msk.bf16.mxu0 %vm649_vm0, %v648_v0  ;;  %522 = vmatpush3.bf16.msra.mxu0 %v565_v18 }
  0x59   :  { %523 = vmatprep.subr.bf16.mxu0 %v648_v0 }
  0x5c   :  { %524 = vmatpush3.bf16.msra.mxu0 %v566_v19 }
  0x5d   :  { %525 = vmatprep.subr.bf16.mxu0 %v648_v0 }
  0x60   :  { %526 = vmatpush3.bf16.msra.mxu0 %v567_v20 }
  0x61   :  { %527 = vmatprep.subr.bf16.mxu0 %v648_v0 }
  0x64   :  { %528 = vmatpush3.bf16.msra.mxu0 %v568_v21 }
  0x65   :  { %529 = vmatprep.subr.bf16.mxu0 %v648_v0 }
  0x68   :  { %530 = vmatpush3.bf16.msra.mxu0 %v569_v22 }
  0x69   :  { %531 = vmatprep.subr.bf16.mxu0 %v648_v0 }
  0x6c   :  { %532 = vmatpush3.bf16.msra.mxu0 %v570_v23 }
  0x6d   :  { %533 = vmatprep.subr.bf16.mxu0 %v648_v0 }
  0x70   :  { %534 = vmatpush3.bf16.msra.mxu0 %v571_v34 }
  0x71   :  { %535 = vmatprep.subr.bf16.mxu0 %v648_v0 }
  0x74   :  { %536 = vmatpush3.bf16.msra.mxu0 %v572_v35 }
 0x12a   :  { %v181_v25 = vpop.f32.mrb[0].mxu0 }
 0x12b   :  { %v182_v26 = vadd.f32 %v426_v24, %v181_v25  ;;  %v499_v27 = vpop.f32.mrb[1].mxu0 }
 0x12c   :  { %v184_v28 = vpop.f32.mrb[2].mxu0 }
 0x12d   :  { %v185_v29 = vadd.f32 %v426_v24, %v184_v28  ;;  %v500_v30 = vpop.f32.mrb[3].mxu0  ;;  %v188_v31 = vmax.f32 %v182_v26, 0.0 }
 0x12f   :  { %v189_v32 = vmax.f32 %v185_v29, 0.0 }
 0x131   :  { %v206_v33 = vpack.c.bf16 %v189_v32, %v188_v31 }
 0x133   :  { %518 = vmatmul.mubr.bf16.vlgmr.msra.gmra.mrb[0].mxu1 %v206_v33 }
 0x206   :  { %v296_v37 = vpop.f32.mrb[0].mxu1 }
 0x207   :  { %v297_v38 = vadd.f32 %v436_v36, %v296_v37  ;;  %v519_v39 = vpop.f32.mrb[1].mxu1 }
 0x208   :  { %v299_v40 = vpop.f32.mrb[2].mxu1 }
 0x209   :  { %v300_v41 = vadd.f32 %v436_v36, %v299_v40  ;;  %v520_v42 = vpop.f32.mrb[3].mxu1  ;;  %v303_v43 = vmax.f32 %v297_v38, 0.0 }
 0x20b   :  { %v304_v44 = vmax.f32 %v300_v41, 0.0 }
 0x20d   :  { %v321_v45 = vpack.c.bf16 %v304_v44, %v303_v43 }
 0x20f   :  { %538 = vmatmul.mubr.bf16.vlgmr.msra.gmra.mrb[4].mxu0 %v321_v45 }
 0x2e2   :  { %v411_v47 = vpop.f32.mrb[4].mxu0 }
 0x2e3   :  { %v412_v48 = vadd.f32 %v445_v46, %v411_v47  ;;  %v539_v49 = vpop.f32.mrb[5].mxu0 }
 0x2e4   :  { %v414_v50 = vpop.f32.mrb[6].mxu0 }
 0x2e5   :  { %418 = vst [vmem:[%s797_s7] sm:$0xff] %v412_v48  ;;  %v415_v51 = vadd.f32 %v445_v46, %v414_v50  ;;  %v540_v52 = vpop.f32.mrb[7].mxu0 }
 0x2e7   :  { %419 = vst [vmem:[%s797_s7 + $0x8] sm:$0xff] %v415_v51 }
 0x2e8   :  { %424 = vsyncpa [#allocation3], 1 }
 0x2e9   :  { %425 = vsyncpa [#allocation5], 1 }

</bundles_post_ra>
